<compile_context>
chip_gen: v6e
topology: v6e:2x2x1
jax: 0.10.0
libtpu: 0.0.40
codegen_flags: <defaults>
</compile_context>

<pallas_src>
import jax
import jax.numpy as jnp
from jax.experimental import pallas as pl
from jax.experimental.pallas import tpu as pltpu


_LANES = 128


def _round_up(v, m=_LANES):
    return ((v + m - 1) // m) * m


def _pad2(x, rows, cols):
    return jnp.pad(x, ((0, rows - x.shape[0]), (0, cols - x.shape[1])))


# -----------------------------------------------------------------------------
# Fully fused forward kernel.
#   a_ref    : [Np, Np]       dense adjacency (bf16, values {0,1})
#   x_ref    : [Np, Fp]       node features (f32, zero-padded)
#   w1_ref   : [2*Fp, Hp]     vstack([W1_l, W1_r])  (f32, zero-padded)
#   b1_ref   : [1, Hp]        bias of layer-1 lin_l
#   w2_ref   : [Hp, 2*Dp]     hstack([W2_l, W2_r])  (f32, zero-padded)
#   b2_ref   : [1, Dp]        bias of layer-2 lin_l
#   esrc_ref : [1, Ep] int32  source node id per edge (lane-major)
#   edst_ref : [1, Ep] int32  destination node id per edge
#   o_ref    : [1, Ep] f32    sigmoid link scores (lane-major)
# -----------------------------------------------------------------------------
def _graphsage_fused_kernel(a_ref, x_ref, w1_ref, b1_ref, w2_ref, b2_ref,
                            esrc_ref, edst_ref, o_ref):
    n = a_ref.shape[0]
    d_pad = w2_ref.shape[1] // 2
    e_pad = esrc_ref.shape[1]

    a = a_ref[...].astype(jnp.float32)           # bf16 {0,1} -> exact f32
    x = x_ref[...]                               # (Np, Fp)

    # ---- layer 1:  h1 = relu( concat([A@x, x]) @ [W1_l; W1_r] + b1 ) -------
    agg1 = jnp.dot(a, x, preferred_element_type=jnp.float32)            # (Np, Fp)
    cat1 = jnp.concatenate([agg1, x], axis=-1)                          # (Np, 2Fp)
    h1 = jnp.dot(cat1, w1_ref[...], preferred_element_type=jnp.float32)
    h1 = jnp.maximum(h1 + b1_ref[...], 0.0)                             # (Np, Hp)
    # dropout: identity (eval / inference semantics)

    # ---- layer 2 (reordered):  h2 = A @ (h1 @ W2_l) + h1 @ W2_r + b2 -------
    t = jnp.dot(h1, w2_ref[...], preferred_element_type=jnp.float32)    # (Np, 2Dp)
    z = t[:, :d_pad]                      # h1 @ W2_l
    r = t[:, d_pad:]                      # h1 @ W2_r
    h2 = jnp.dot(a, z, preferred_element_type=jnp.float32) + r + b2_ref[...]

    # ---- edge gather via one-hot selection matmul (MXU) + dot-product score
    node_ids = jax.lax.broadcasted_iota(jnp.int32, (n, e_pad), 0)       # (Np, Ep)
    src_sel = (node_ids == esrc_ref[...]).astype(jnp.float32)           # (Np, Ep)
    dst_sel = (node_ids == edst_ref[...]).astype(jnp.float32)           # (Np, Ep)

    h2t = h2.T                                                          # (Dp, Np)
    src_t = jnp.dot(h2t, src_sel, preferred_element_type=jnp.float32)   # (Dp, Ep)
    dst_t = jnp.dot(h2t, dst_sel, preferred_element_type=jnp.float32)   # (Dp, Ep)

    score = jnp.sum(src_t * dst_t, axis=0, keepdims=True)               # (1, Ep)
    o_ref[...] = jax.nn.sigmoid(score).astype(o_ref.dtype)


# -----------------------------------------------------------------------------
# Wrapper: pad / repack operands (lane-dense, 128-multiples), single pallas_call
# -----------------------------------------------------------------------------
def _graphsage_pallas_forward(params, Features, A, E):
    n, f_in = Features.shape
    h_dim = params["w1_l"].shape[1]
    d_dim = params["w2_l"].shape[1]
    n_edges = E.shape[1]

    n_p = _round_up(n)
    f_p = _round_up(f_in)
    h_p = _round_up(h_dim)
    d_p = _round_up(d_dim)
    e_p = _round_up(n_edges)

    # Zero-padded operands. A is {0,1} so bf16 storage is exact (halves DMA).
    a_bf16 = _pad2(A, n_p, n_p).astype(jnp.bfloat16)
    x_p = _pad2(Features, n_p, f_p)
    w1_cat = jnp.concatenate([_pad2(params["w1_l"], f_p, h_p),
                              _pad2(params["w1_r"], f_p, h_p)], axis=0)   # (2Fp, Hp)
    b1_p = _pad2(params["b1"], 1, h_p)
    w2_cat = jnp.concatenate([_pad2(params["w2_l"], h_p, d_p),
                              _pad2(params["w2_r"], h_p, d_p)], axis=1)   # (Hp, 2Dp)
    b2_p = _pad2(params["b2"], 1, d_p)
    e_src = jnp.pad(E[0:1].astype(jnp.int32), ((0, 0), (0, e_p - n_edges)))
    e_dst = jnp.pad(E[1:2].astype(jnp.int32), ((0, 0), (0, e_p - n_edges)))

    scores = pl.pallas_call(
        _graphsage_fused_kernel,
        out_shape=jax.ShapeDtypeStruct((1, e_p), jnp.float32),
        in_specs=[
            pl.BlockSpec((n_p, n_p), lambda: (0, 0)),
            pl.BlockSpec((n_p, f_p), lambda: (0, 0)),
            pl.BlockSpec((2 * f_p, h_p), lambda: (0, 0)),
            pl.BlockSpec((1, h_p), lambda: (0, 0)),
            pl.BlockSpec((h_p, 2 * d_p), lambda: (0, 0)),
            pl.BlockSpec((1, d_p), lambda: (0, 0)),
            pl.BlockSpec((1, e_p), lambda: (0, 0)),
            pl.BlockSpec((1, e_p), lambda: (0, 0)),
        ],
        out_specs=pl.BlockSpec((1, e_p), lambda: (0, 0)),
        compiler_params=pltpu.CompilerParams(vmem_limit_bytes=32 * 1024 * 1024),
    )(a_bf16, x_p, w1_cat, b1_p, w2_cat, b2_p, e_src, e_dst)

    return scores[0, :n_edges]


graphsage_net_forward = jax.jit(_graphsage_pallas_forward)


# -----------------------------------------------------------------------------
# Pure-JAX reference (unpadded, original operation order) for verification.
# -----------------------------------------------------------------------------
def _reference_forward(params, Features, A, E):
    h1 = jnp.maximum(
        (A @ Features) @ params["w1_l"] + Features @ params["w1_r"] + params["b1"],
        0.0)
    h2 = (A @ h1) @ params["w2_l"] + h1 @ params["w2_r"] + params["b2"]
    src = h2[E[0]]
    dst = h2[E[1]]
    return jax.nn.sigmoid(jnp.sum(src * dst, axis=-1))


def init_params(key, input_dim, hidden_dim, output_dim):
    ks = jax.random.split(key, 6)
    scale1 = 1.0 / jnp.sqrt(input_dim)
    scale2 = 1.0 / jnp.sqrt(hidden_dim)
    return {
        # weights stored pre-transposed as [Fin, Fout]
        "w1_l": jax.random.uniform(ks[0], (input_dim, hidden_dim), jnp.float32,
                                   -scale1, scale1),
        "w1_r": jax.random.uniform(ks[1], (input_dim, hidden_dim), jnp.float32,
                                   -scale1, scale1),
        "b1": jax.random.uniform(ks[2], (1, hidden_dim), jnp.float32,
                                 -scale1, scale1),
        "w2_l": jax.random.uniform(ks[3], (hidden_dim, output_dim), jnp.float32,
                                   -scale2, scale2),
        "w2_r": jax.random.uniform(ks[4], (hidden_dim, output_dim), jnp.float32,
                                   -scale2, scale2),
        "b2": jax.random.uniform(ks[5], (1, output_dim), jnp.float32,
                                 -scale2, scale2),
    }


if __name__ == "__main__":
    key = jax.random.PRNGKey(0)
    k_feat, k_adj, k_edge, k_par = jax.random.split(key, 4)

    N = 128            # number of graph nodes
    input_dim = 16
    hidden_dim = 32
    output_dim = 8
    num_edges = 64     # edges to score

    Features = jax.random.normal(k_feat, (N, input_dim), dtype=jnp.float32)
    # dense adjacency (sum aggregation), no self-loops
    A = (jax.random.uniform(k_adj, (N, N)) < 0.05).astype(jnp.float32)
    A = A * (1.0 - jnp.eye(N, dtype=jnp.float32))
    E = jax.random.randint(k_edge, (2, num_edges), 0, N, dtype=jnp.int32)

    params = init_params(k_par, input_dim, hidden_dim, output_dim)

    out = jax.block_until_ready(graphsage_net_forward(params, Features, A, E))
    ref = jax.block_until_ready(_reference_forward(params, Features, A, E))

    assert out.shape == (num_edges,)
    assert bool(jnp.all(jnp.isfinite(out)))
    max_err = float(jnp.max(jnp.abs(out - ref)))
    assert bool(jnp.allclose(out, ref, rtol=1e-3, atol=1e-3)), max_err
    print("KERNEL_OK")
</pallas_src>

<mosaic_0001>
module attributes {stable_mosaic.version = 11 : i64} {
  func.func @_graphsage_fused_kernel(%arg0: memref<128x128xbf16, #tpu.memory_space<vmem>>, %arg1: memref<128x128xf32, #tpu.memory_space<vmem>>, %arg2: memref<256x128xf32, #tpu.memory_space<vmem>>, %arg3: memref<1x128xf32, #tpu.memory_space<vmem>>, %arg4: memref<128x256xf32, #tpu.memory_space<vmem>>, %arg5: memref<1x128xf32, #tpu.memory_space<vmem>>, %arg6: memref<1x128xi32, #tpu.memory_space<vmem>>, %arg7: memref<1x128xi32, #tpu.memory_space<vmem>>, %arg8: memref<1x128xf32, #tpu.memory_space<vmem>>) attributes {dimension_semantics = [], scalar_prefetch = 0 : i64, scratch_operands = 0 : i64, tpu.core_type = #tpu.core_type<tc>} {
    %c0 = arith.constant 0 : index
    %c0_0 = arith.constant 0 : index
    %0 = vector.load %arg0[%c0, %c0_0] : memref<128x128xbf16, #tpu.memory_space<vmem>>, vector<128x128xbf16>
    %1 = arith.extf %0 : vector<128x128xbf16> to vector<128x128xf32>
    %c0_1 = arith.constant 0 : index
    %c0_2 = arith.constant 0 : index
    %2 = vector.load %arg1[%c0_1, %c0_2] : memref<128x128xf32, #tpu.memory_space<vmem>>, vector<128x128xf32>
    %cst = arith.constant dense<0.000000e+00> : vector<128x128xf32>
    %3 = tpu.matmul %1, %2, %cst {dimension_numbers = #tpu.dot_dimension_numbers<[1], [0], [0], [1], [0, 0, 1, 1], [], []>} : vector<128x128xf32>, vector<128x128xf32>, vector<128x128xf32> -> vector<128x128xf32>
    %4 = tpu.concatenate %3, %2 in 1 : vector<128x128xf32>, vector<128x128xf32> -> vector<128x256xf32>
    %c0_3 = arith.constant 0 : index
    %c0_4 = arith.constant 0 : index
    %5 = vector.load %arg2[%c0_3, %c0_4] : memref<256x128xf32, #tpu.memory_space<vmem>>, vector<256x128xf32>
    %cst_5 = arith.constant dense<0.000000e+00> : vector<128x128xf32>
    %6 = tpu.matmul %4, %5, %cst_5 {dimension_numbers = #tpu.dot_dimension_numbers<[1], [0], [0], [1], [0, 0, 1, 1], [], []>} : vector<128x256xf32>, vector<256x128xf32>, vector<128x128xf32> -> vector<128x128xf32>
    %c0_6 = arith.constant 0 : index
    %c0_7 = arith.constant 0 : index
    %7 = vector.load %arg3[%c0_6, %c0_7] : memref<1x128xf32, #tpu.memory_space<vmem>>, vector<1x128xf32>
    %8 = vector.broadcast %7 : vector<1x128xf32> to vector<128x128xf32>
    %9 = arith.addf %6, %8 : vector<128x128xf32>
    %cst_8 = arith.constant 0.000000e+00 : f32
    %10 = vector.broadcast %cst_8 : f32 to vector<128x128xf32>
    %11 = arith.maximumf %9, %10 : vector<128x128xf32>
    %c0_9 = arith.constant 0 : index
    %c0_10 = arith.constant 0 : index
    %12 = vector.load %arg4[%c0_9, %c0_10] : memref<128x256xf32, #tpu.memory_space<vmem>>, vector<128x256xf32>
    %cst_11 = arith.constant dense<0.000000e+00> : vector<128x256xf32>
    %13 = tpu.matmul %11, %12, %cst_11 {dimension_numbers = #tpu.dot_dimension_numbers<[1], [0], [0], [1], [0, 0, 1, 1], [], []>} : vector<128x128xf32>, vector<128x256xf32>, vector<128x256xf32> -> vector<128x256xf32>
    %14 = vector.extract_strided_slice %13 {offsets = [0, 0], sizes = [128, 128], strides = [1, 1]} : vector<128x256xf32> to vector<128x128xf32>
    %15 = vector.extract_strided_slice %13 {offsets = [0, 128], sizes = [128, 128], strides = [1, 1]} : vector<128x256xf32> to vector<128x128xf32>
    %cst_12 = arith.constant dense<0.000000e+00> : vector<128x128xf32>
    %16 = tpu.matmul %1, %14, %cst_12 {dimension_numbers = #tpu.dot_dimension_numbers<[1], [0], [0], [1], [0, 0, 1, 1], [], []>} : vector<128x128xf32>, vector<128x128xf32>, vector<128x128xf32> -> vector<128x128xf32>
    %17 = arith.addf %16, %15 : vector<128x128xf32>
    %c0_13 = arith.constant 0 : index
    %c0_14 = arith.constant 0 : index
    %18 = vector.load %arg5[%c0_13, %c0_14] : memref<1x128xf32, #tpu.memory_space<vmem>>, vector<1x128xf32>
    %19 = vector.broadcast %18 : vector<1x128xf32> to vector<128x128xf32>
    %20 = arith.addf %17, %19 : vector<128x128xf32>
    %21 = tpu.iota {dimensions = array<i32: 0>} : vector<128x128xi32>
    %c0_15 = arith.constant 0 : index
    %c0_16 = arith.constant 0 : index
    %22 = vector.load %arg6[%c0_15, %c0_16] : memref<1x128xi32, #tpu.memory_space<vmem>>, vector<1x128xi32>
    %23 = vector.broadcast %22 : vector<1x128xi32> to vector<128x128xi32>
    %24 = arith.cmpi eq, %21, %23 : vector<128x128xi32>
    %25 = arith.extui %24 : vector<128x128xi1> to vector<128x128xi32>
    %26 = arith.sitofp %25 : vector<128x128xi32> to vector<128x128xf32>
    %c0_17 = arith.constant 0 : index
    %c0_18 = arith.constant 0 : index
    %27 = vector.load %arg7[%c0_17, %c0_18] : memref<1x128xi32, #tpu.memory_space<vmem>>, vector<1x128xi32>
    %28 = vector.broadcast %27 : vector<1x128xi32> to vector<128x128xi32>
    %29 = arith.cmpi eq, %21, %28 : vector<128x128xi32>
    %30 = arith.extui %29 : vector<128x128xi1> to vector<128x128xi32>
    %31 = arith.sitofp %30 : vector<128x128xi32> to vector<128x128xf32>
    %32 = tpu.transpose %20, [1, 0] : vector<128x128xf32> -> vector<128x128xf32>
    %cst_19 = arith.constant dense<0.000000e+00> : vector<128x128xf32>
    %33 = tpu.matmul %32, %26, %cst_19 {dimension_numbers = #tpu.dot_dimension_numbers<[1], [0], [0], [1], [0, 0, 1, 1], [], []>} : vector<128x128xf32>, vector<128x128xf32>, vector<128x128xf32> -> vector<128x128xf32>
    %cst_20 = arith.constant dense<0.000000e+00> : vector<128x128xf32>
    %34 = tpu.matmul %32, %31, %cst_20 {dimension_numbers = #tpu.dot_dimension_numbers<[1], [0], [0], [1], [0, 0, 1, 1], [], []>} : vector<128x128xf32>, vector<128x128xf32>, vector<128x128xf32> -> vector<128x128xf32>
    %35 = arith.mulf %33, %34 : vector<128x128xf32>
    %cst_21 = arith.constant dense<0.000000e+00> : vector<128xf32>
    %36 = vector.multi_reduction <add>, %35, %cst_21 [0] : vector<128x128xf32> to vector<128xf32>
    %37 = vector.shape_cast %36 : vector<128xf32> to vector<1x128xf32>
    %38 = arith.negf %37 : vector<1x128xf32>
    %39 = math.exp %38 : vector<1x128xf32>
    %cst_22 = arith.constant 1.000000e+00 : f32
    %40 = vector.broadcast %cst_22 : f32 to vector<1x128xf32>
    %41 = arith.addf %40, %39 : vector<1x128xf32>
    %42 = arith.divf %40, %41 : vector<1x128xf32>
    %c0_23 = arith.constant 0 : index
    %c0_24 = arith.constant 0 : index
    %43 = vector.load %arg8[%c0_23, %c0_24] : memref<1x128xf32, #tpu.memory_space<vmem>>, vector<1x128xf32>
    tpu.vector_store %arg8[%c0_23, %c0_24], %42 {strides = array<i32>} : memref<1x128xf32, #tpu.memory_space<vmem>>, vector<1x128xf32>,
    return
  }
}

</mosaic_0001>

<bundles_post_ra>
// kernel: _graphsage_pallas_forward.1
= control target key start
LH: loop header
LB: loop body
LE: loop exit
PB: predicated region body
PF: predicated region fallthrough
CT: control target
= control target key end

     0   :  { %s2540_s1 = inlined_call_operand.vmem [shape: f32[128,128], index: 1, kind: input, shape index: {}]   ;;  %s2541_s0 = inlined_call_operand.vmem [shape: bf16[128,128], index: 0, kind: input, shape index: {}]   ;;  %s2542_s2 = inlined_call_operand.vmem [shape: f32[256,128], index: 2, kind: input, shape index: {}]   ;;  %s2543_s4 = inlined_call_operand.vmem [shape: f32[128,256], index: 4, kind: input, shape index: {}]   ;;  %s2544_s3 = inlined_call_operand.vmem [shape: f32[1,128], index: 3, kind: input, shape index: {}]   ;;  %s2545_s6 = inlined_call_operand.vmem [shape: s32[1,128], index: 6, kind: input, shape index: {}]   ;;  %s2546_s7 = inlined_call_operand.vmem [shape: s32[1,128], index: 7, kind: input, shape index: {}]   ;;  %s2547_s5 = inlined_call_operand.vmem [shape: f32[1,128], index: 5, kind: input, shape index: {}]   ;;  %s2548_s8 = inlined_call_operand.vmem [shape: f32[1,128], index: 8, kind: output, shape index: {}]  }
   0x1   :  { %v1872_v0 = vld [vmem:[%s2540_s1 + $0x78] sm:$0xff]  ;;  %v1877_v1 = vld [vmem:[%s2540_s1 + $0x70] sm:$0xff]  ;;  %v1884_v2 = vld [vmem:[%s2540_s1 + $0x68] sm:$0xff] }
   0x2   :  { %1592 = vmatprep.subr.mxu0 %v1872_v0  ;;  %v1891_v3 = vld [vmem:[%s2540_s1 + $0x60] sm:$0xff]  ;;  %v1908_v6 = vld [vmem:[%s2540_s1 + $0x58] sm:$0xff]  ;;  %v1916_v8 = vld [vmem:[%s2540_s1 + $0x50] sm:$0xff] }
   0x3   :  { %1593 = vmatpush3.msra.mxu0 %v1872_v0  ;;  %v1897_v4 = vld [vmem:[%s2540_s1] sm:$0xff]  ;;  %v253_v9 = vld [vmem:[%s2542_s2 + $0xf8] sm:$0xff]  ;;  %v252_v11 = vld [vmem:[%s2542_s2 + $0xf0] sm:$0xff] }
   0x4   :  { %1594 = vmatprep.subr.mxu0 %v1877_v1  ;;  %v1902_v5 = vld [vmem:[%s2541_s0] sm:$0xff]   ;;  %325 = vmatprep.mubr.f32.mxu1 %v1897_v4  ;;  %v237_v10 = vld [vmem:[%s2542_s2 + $0x78] sm:$0xff]  ;;  %v236_v12 = vld [vmem:[%s2542_s2 + $0x70] sm:$0xff] }
   0x5   :  { %1595 = vmatpush3.msra.mxu0 %v1877_v1  ;;  %v1347_v7 = vunpack.c.l.bf16 %v1902_v5  ;;  %1416 = vmatprep.subr.mxu1 %v253_v9  ;;  %v1938_v13 = vld [vmem:[%s2540_s1 + $0x48] sm:$0xff]  ;;  %v1951_v16 = vld [vmem:[%s2540_s1 + $0x40] sm:$0xff]  ;;  %v1964_v19 = vld [vmem:[%s2540_s1 + $0x38] sm:$0xff]  ;;  %v1348_v42 = vunpack.c.h.bf16 %v1902_v5  ;;  %v783_v5 = vlaneseq }
   0x6   :  { %1596 = vmatprep.subr.mxu0 %v1884_v2  ;;  %1417 = vmatpush3.msra.mxu1 %v237_v10  ;;  %v251_v14 = vld [vmem:[%s2542_s2 + $0xe8] sm:$0xff]  ;;  %v250_v17 = vld [vmem:[%s2542_s2 + $0xe0] sm:$0xff]  ;;  %v249_v20 = vld [vmem:[%s2542_s2 + $0xd8] sm:$0xff] }
   0x7   :  { %1597 = vmatpush3.msra.mxu0 %v1884_v2  ;;  %1624 = vmatprep.mubr.f32.mxu0 %v1347_v7  ;;  %v235_v15 = vld [vmem:[%s2542_s2 + $0x68] sm:$0xff]  ;;  %v234_v18 = vld [vmem:[%s2542_s2 + $0x60] sm:$0xff]  ;;  %v233_v21 = vld [vmem:[%s2542_s2 + $0x58] sm:$0xff] }
   0x8   :  { %1598 = vmatprep.subr.mxu0 %v1891_v3  ;;  %1418 = vmatprep.subr.mxu1 %v252_v11  ;;  %v1977_v22 = vld [vmem:[%s2540_s1 + $0x30] sm:$0xff]  ;;  %v1990_v25 = vld [vmem:[%s2540_s1 + $0x28] sm:$0xff]  ;;  %v2003_v28 = vld [vmem:[%s2540_s1 + $0x20] sm:$0xff] }
   0x9   :  { %1599 = vmatpush3.msra.mxu0 %v1891_v3  ;;  %1419 = vmatpush3.msra.mxu1 %v236_v12  ;;  %v248_v23 = vld [vmem:[%s2542_s2 + $0xd0] sm:$0xff]  ;;  %v247_v26 = vld [vmem:[%s2542_s2 + $0xc8] sm:$0xff]  ;;  %v246_v29 = vld [vmem:[%s2542_s2 + $0xc0] sm:$0xff] }
   0xa   :  { %1600 = vmatprep.subr.mxu0 %v1908_v6  ;;  %1420 = vmatprep.subr.mxu1 %v251_v14  ;;  %v232_v24 = vld [vmem:[%s2542_s2 + $0x50] sm:$0xff]  ;;  %v231_v27 = vld [vmem:[%s2542_s2 + $0x48] sm:$0xff]  ;;  %v230_v30 = vld [vmem:[%s2542_s2 + $0x40] sm:$0xff] }
   0xb   :  { %1601 = vmatpush3.msra.mxu0 %v1908_v6  ;;  %1421 = vmatpush3.msra.mxu1 %v235_v15  ;;  %v2016_v31 = vld [vmem:[%s2540_s1 + $0x18] sm:$0xff]  ;;  %v2029_v34 = vld [vmem:[%s2540_s1 + $0x10] sm:$0xff]  ;;  %v2042_v37 = vld [vmem:[%s2540_s1 + $0x8] sm:$0xff] }
   0xc   :  { %1602 = vmatprep.subr.mxu0 %v1916_v8  ;;  %1422 = vmatprep.subr.mxu1 %v250_v17  ;;  %v245_v32 = vld [vmem:[%s2542_s2 + $0xb8] sm:$0xff]  ;;  %v244_v35 = vld [vmem:[%s2542_s2 + $0xb0] sm:$0xff]  ;;  %v243_v38 = vld [vmem:[%s2542_s2 + $0xa8] sm:$0xff] }
   0xd   :  { %1603 = vmatpush3.msra.mxu0 %v1916_v8  ;;  %1423 = vmatpush3.msra.mxu1 %v234_v18  ;;  %v229_v33 = vld [vmem:[%s2542_s2 + $0x38] sm:$0xff]  ;;  %v228_v36 = vld [vmem:[%s2542_s2 + $0x30] sm:$0xff]  ;;  %v2051_v39 = vld [vmem:[%s2541_s0 + $0x8] sm:$0xff]  }
   0xe   :  { %1604 = vmatprep.subr.mxu0 %v1938_v13  ;;  %1424 = vmatprep.subr.mxu1 %v249_v20  ;;  %v227_v40 = vld [vmem:[%s2542_s2 + $0x28] sm:$0xff]  ;;  %v242_v41 = vld [vmem:[%s2542_s2 + $0xa0] sm:$0xff]  ;;  %v1351_v44 = vunpack.c.l.bf16 %v2051_v39  ;;  %v241_v45 = vld [vmem:[%s2542_s2 + $0x98] sm:$0xff]  ;;  %v1352_v49 = vunpack.c.h.bf16 %v2051_v39  ;;  %v2376_v39 = vshrl.u32 %v783_v5, 7 }
   0xf   :  { %1605 = vmatpush3.msra.mxu0 %v1938_v13  ;;  %1425 = vmatpush3.msra.mxu1 %v233_v21  ;;  %v226_v43 = vld [vmem:[%s2542_s2 + $0x20] sm:$0xff]  ;;  %v2074_v46 = vld [vmem:[%s2541_s0 + $0x10] sm:$0xff]   ;;  %v225_v47 = vld [vmem:[%s2542_s2 + $0x18] sm:$0xff] }
  0x10   :  { %1606 = vmatprep.subr.mxu0 %v1951_v16  ;;  %1426 = vmatprep.subr.mxu1 %v248_v23  ;;  %v240_v48 = vld [vmem:[%s2542_s2 + $0x90] sm:$0xff]  ;;  %v1355_v51 = vunpack.c.l.bf16 %v2074_v46  ;;  %v239_v52 = vld [vmem:[%s2542_s2 + $0x88] sm:$0xff]  ;;  %v2098_v53 = vld [vmem:[%s2541_s0 + $0x18] sm:$0xff]   ;;  %v1356_v54 = vunpack.c.h.bf16 %v2074_v46 }
  0x11   :  { %1607 = vmatpush3.msra.mxu0 %v1951_v16  ;;  %1427 = vmatpush3.msra.mxu1 %v232_v24  ;;  %v224_v50 = vld [vmem:[%s2542_s2 + $0x10] sm:$0xff]  ;;  %v1359_v55 = vunpack.c.l.bf16 %v2098_v53  ;;  %v2109_v56 = vld [vmem:[%s2541_s0 + $0x20] sm:$0xff]   ;;  %v1360_v57 = vunpack.c.h.bf16 %v2098_v53  ;;  %v2120_v59 = vld [vmem:[%s2541_s0 + $0x28] sm:$0xff]   ;;  %v797_v53 = vadd.s32 104, %v2376_v39 }
  0x12   :  { %1608 = vmatprep.subr.mxu0 %v1964_v19  ;;  %1428 = vmatprep.subr.mxu1 %v247_v26  ;;  %v1363_v58 = vunpack.c.l.bf16 %v2109_v56  ;;  %v1364_v60 = vunpack.c.h.bf16 %v2109_v56  ;;  %v1367_v61 = vunpack.c.l.bf16 %v2120_v59  ;;  %v2131_v62 = vld [vmem:[%s2541_s0 + $0x30] sm:$0xff]   ;;  %v1368_v63 = vunpack.c.h.bf16 %v2120_v59  ;;  %v2142_v9 = vld [vmem:[%s2541_s0 + $0x38] sm:$0xff]   ;;  %v223_v14 = vld [vmem:[%s2542_s2 + $0x8] sm:$0xff] }
  0x13   :  { %1609 = vmatpush3.msra.mxu0 %v1964_v19  ;;  %1429 = vmatpush3.msra.mxu1 %v231_v27  ;;  %v1372_v10 = vunpack.c.h.bf16 %v2131_v62  ;;  %v1375_v11 = vunpack.c.l.bf16 %v2142_v9  ;;  %v1376_v12 = vunpack.c.h.bf16 %v2142_v9  ;;  %v238_v15 = vld [vmem:[%s2542_s2 + $0x80] sm:$0xff]  ;;  %v453_v18 = vld [vmem:[%s2543_s4 + $0xf8] sm:$0xff]  ;;  %v452_v20 = vld [vmem:[%s2543_s4 + $0xf0] sm:$0xff]  ;;  %v794_v56 = vadd.s32 80, %v2376_v39 }
  0x14   :  { %1610 = vmatprep.subr.mxu0 %v1977_v22  ;;  %1430 = vmatprep.subr.mxu1 %v246_v29  ;;  %v222_v17 = vld [vmem:[%s2542_s2] sm:$0xff]  ;;  %v451_v21 = vld [vmem:[%s2543_s4 + $0xe8] sm:$0xff]  ;;  %v449_v24 = vld [vmem:[%s2543_s4 + $0xd8] sm:$0xff]  ;;  %v791_v59 = vadd.s32 56, %v2376_v39 }
  0x15   :  { %1611 = vmatpush3.msra.mxu0 %v1977_v22  ;;  %1431 = vmatpush3.msra.mxu1 %v230_v30  ;;  %v450_v23 = vld [vmem:[%s2543_s4 + $0xe0] sm:$0xff]  ;;  %v448_v26 = vld [vmem:[%s2543_s4 + $0xd0] sm:$0xff]  ;;  %v447_v27 = vld [vmem:[%s2543_s4 + $0xc8] sm:$0xff] }
  0x16   :  { %1612 = vmatprep.subr.mxu0 %v1990_v25  ;;  %1432 = vmatprep.subr.mxu1 %v245_v32  ;;  %v446_v29 = vld [vmem:[%s2543_s4 + $0xc0] sm:$0xff]  ;;  %v445_v30 = vld [vmem:[%s2543_s4 + $0xb8] sm:$0xff]  ;;  %v444_v32 = vld [vmem:[%s2543_s4 + $0xb0] sm:$0xff] }
  0x17   :  { %1613 = vmatpush3.msra.mxu0 %v1990_v25  ;;  %1433 = vmatpush3.msra.mxu1 %v229_v33  ;;  %v443_v33 = vld [vmem:[%s2543_s4 + $0xa8] sm:$0xff]  ;;  %v2387_v46 = vld [vmem:[%s2546_s7] ss:$0 sm:$0xff] }
  0x18   :  { %1614 = vmatprep.subr.mxu0 %v2003_v28  ;;  %1434 = vmatprep.subr.mxu1 %v244_v35  ;;  %v442_v35 = vld [vmem:[%s2543_s4 + $0xa0] sm:$0xff]  ;;  %vm871_vm5 = vcmp.eq.s32.totalorder %v797_v53, %v2387_v46  ;;  %vm868_vm11 = vcmp.eq.s32.totalorder %v794_v56, %v2387_v46 }
  0x19   :  { %1615 = vmatpush3.msra.mxu0 %v2003_v28  ;;  %1435 = vmatpush3.msra.mxu1 %v228_v36  ;;  %v441_v36 = vld [vmem:[%s2543_s4 + $0x98] sm:$0xff] }
  0x1a   :  { %1616 = vmatprep.subr.mxu0 %v2016_v31  ;;  %1436 = vmatprep.subr.mxu1 %v243_v38  ;;  %v440_v38 = vld [vmem:[%s2543_s4 + $0x90] sm:$0xff] }
  0x1b   :  { %1617 = vmatpush3.msra.mxu0 %v2016_v31  ;;  %1437 = vmatpush3.msra.mxu1 %v227_v40  ;;  %v439_v40 = vld [vmem:[%s2543_s4 + $0x88] sm:$0xff] }
  0x1c   :  { %1618 = vmatprep.subr.mxu0 %v2029_v34  ;;  %1438 = vmatprep.subr.mxu1 %v242_v41  ;;  %v438_v41 = vld [vmem:[%s2543_s4 + $0x80] sm:$0xff] }
  0x1d   :  { %1619 = vmatpush3.msra.mxu0 %v2029_v34  ;;  %1439 = vmatpush3.msra.mxu1 %v226_v43  ;;  %v437_v43 = vld [vmem:[%s2543_s4 + $0x78] sm:$0xff] }
  0x1e   :  { %1620 = vmatprep.subr.mxu0 %v2042_v37  ;;  %1440 = vmatprep.subr.mxu1 %v241_v45  ;;  %v436_v45 = vld [vmem:[%s2543_s4 + $0x70] sm:$0xff] }
  0x1f   :  { %1621 = vmatpush3.msra.mxu0 %v2042_v37  ;;  %1441 = vmatpush3.msra.mxu1 %v225_v47  ;;  %v435_v47 = vld [vmem:[%s2543_s4 + $0x68] sm:$0xff] }
  0x20   :  { %1622 = vmatprep.subr.mxu0 %v1897_v4  ;;  %1442 = vmatprep.subr.mxu1 %v240_v48  ;;  %v434_v48 = vld [vmem:[%s2543_s4 + $0x60] sm:$0xff] }
  0x21   :  { %1623 = vmatpush3.msra.mxu0 %v1897_v4  ;;  %1443 = vmatpush3.msra.mxu1 %v224_v50  ;;  %v1371_v4 = vunpack.c.l.bf16 %v2131_v62  ;;  %v433_v50 = vld [vmem:[%s2543_s4 + $0x58] sm:$0xff]  ;;  %v788_v62 = vadd.s32 32, %v2376_v39 }
  0x22   :  { %1625 = vmatmul.mubr.f32.vlgmr.msra.gmra.mxu0 %v1348_v42  ;;  %1444 = vmatprep.subr.mxu1 %v239_v52  ;;  %v432_v52 = vld [vmem:[%s2543_s4 + $0x50] sm:$0xff] }
  0x23   :  { %1627 = vmatprep.mubr.f32.mxu0 %v1351_v44  ;;  %1445 = vmatpush3.msra.mxu1 %v223_v14  ;;  %v431_v14 = vld [vmem:[%s2543_s4 + $0x48] sm:$0xff] }
  0x24   :  { %1446 = vmatprep.subr.mxu1 %v238_v15  ;;  %454 = vmatprep.subr.mxu0 %v453_v18 }
  0x25   :  { %1447 = vmatpush3.msra.mxu1 %v222_v17  ;;  %455 = vmatpush1.msra.mxu0 %v452_v20 }
  0x26   :  { %1628 = vmatmul.mubr.f32.gmra.mxu0 %v1352_v49  ;;  %456 = vmatprep.subr.mxu0 %v451_v21 }
  0x27   :  { %1630 = vmatprep.mubr.f32.mxu0 %v1355_v51  ;;  %457 = vmatpush1.msra.mxu0 %v450_v23 }
  0x28   :  { %458 = vmatprep.subr.mxu0 %v449_v24 }
  0x29   :  { %459 = vmatpush1.msra.mxu0 %v448_v26  ;;  %v423_v26 = vld [vmem:[%s2543_s4 + $0x8] sm:$0xff] }
  0x2a   :  { %1631 = vmatmul.mubr.f32.gmra.mxu0 %v1356_v54  ;;  %460 = vmatprep.subr.mxu0 %v447_v27  ;;  %v422_v27 = vld [vmem:[%s2543_s4] sm:$0xff] }
  0x2b   :  { %1633 = vmatprep.mubr.f32.mxu0 %v1359_v55  ;;  %461 = vmatpush1.msra.mxu0 %v446_v29  ;;  %v1822_v29 = vmov 0.0  }
  0x2c   :  { %462 = vmatprep.subr.mxu0 %v445_v30 }
  0x2d   :  { %463 = vmatpush1.msra.mxu0 %v444_v32  ;;  %v2283_v32 = vld [vmem:[%s2544_s3] ss:$0 sm:$0xff] }
  0x2e   :  { %1634 = vmatmul.mubr.f32.gmra.mxu0 %v1360_v57  ;;  %464 = vmatprep.subr.mxu0 %v443_v33 }
  0x2f   :  { %1636 = vmatprep.mubr.f32.mxu0 %v1363_v58  ;;  %465 = vmatpush1.msra.mxu0 %v442_v35 }
  0x30   :  { %466 = vmatprep.subr.mxu0 %v441_v36 }
  0x31   :  { %467 = vmatpush1.msra.mxu0 %v440_v38 }
  0x32   :  { %1637 = vmatmul.mubr.f32.gmra.mxu0 %v1364_v60  ;;  %468 = vmatprep.subr.mxu0 %v439_v40 }
  0x33   :  { %1639 = vmatprep.mubr.f32.mxu0 %v1367_v61  ;;  %469 = vmatpush1.msra.mxu0 %v438_v41 }
  0x34   :  { %470 = vmatprep.subr.mxu0 %v437_v43 }
  0x35   :  { %471 = vmatpush1.msra.mxu0 %v436_v45 }
  0x36   :  { %1640 = vmatmul.mubr.f32.gmra.mxu0 %v1368_v63  ;;  %472 = vmatprep.subr.mxu0 %v435_v47 }
  0x37   :  { %1642 = vmatprep.mubr.f32.mxu0 %v1371_v4  ;;  %473 = vmatpush1.msra.mxu0 %v434_v48 }
  0x38   :  { %474 = vmatprep.subr.mxu0 %v433_v50 }
  0x39   :  { %475 = vmatpush1.msra.mxu0 %v432_v52 }
  0x3a   :  { %1643 = vmatmul.mubr.f32.gmra.mxu0 %v1372_v10  ;;  %476 = vmatprep.subr.mxu0 %v431_v14 }
  0x3b   :  { %1645 = vmatprep.mubr.f32.mxu0 %v1375_v11 }
  0x3e   :  { %1646 = vmatmul.mubr.f32.gmra.mxu0 %v1376_v12 }
  0x3f   :  { %518 = vmatprep.mubr.f32.mxu0 %v1822_v29 }
  0xe2   :  { %v1626_v15 = vpop.f32.mrf.mxu0 }
  0xe4   :  { %v143_v17 = vpop.f32.mrf.mxu0 }
  0xe5   :  { %326 = vmatmul.mubr.f32.vlgmr.msra.gmra.mxu1 %v143_v17 }
  0xe6   :  { %330 = vmatprep.mubr.f32.mxu1 %v2042_v37  ;;  %v1629_v18 = vpop.f32.mrf.mxu0 }
  0xe8   :  { %v153_v20 = vpop.f32.mrf.mxu0 }
  0xe9   :  { %331 = vmatmul.mubr.f32.gmra.mxu1 %v1626_v15 }
  0xea   :  { %335 = vmatprep.mubr.f32.mxu1 %v2029_v34  ;;  %v1632_v21 = vpop.f32.mrf.mxu0 }
  0xec   :  { %v163_v23 = vpop.f32.mrf.mxu0 }
  0xed   :  { %336 = vmatmul.mubr.f32.gmra.mxu1 %v153_v20 }
  0xee   :  { %340 = vmatprep.mubr.f32.mxu1 %v2016_v31  ;;  %v1635_v24 = vpop.f32.mrf.mxu0 }
  0xf0   :  { %v173_v37 = vpop.f32.mrf.mxu0 }
  0xf1   :  { %341 = vmatmul.mubr.f32.gmra.mxu1 %v1629_v18 }
  0xf2   :  { %345 = vmatprep.mubr.f32.mxu1 %v2003_v28  ;;  %v1638_v34 = vpop.f32.mrf.mxu0 }
  0xf4   :  { %v183_v31 = vpop.f32.mrf.mxu0 }
  0xf5   :  { %346 = vmatmul.mubr.f32.gmra.mxu1 %v163_v23 }
  0xf6   :  { %350 = vmatprep.mubr.f32.mxu1 %v1990_v25  ;;  %v1641_v28 = vpop.f32.mrf.mxu0 }
  0xf8   :  { %v193_v25 = vpop.f32.mrf.mxu0 }
  0xf9   :  { %351 = vmatmul.mubr.f32.gmra.mxu1 %v1632_v21 }
  0xfa   :  { %355 = vmatprep.mubr.f32.mxu1 %v1977_v22  ;;  %v1644_v22 = vpop.f32.mrf.mxu0 }
  0xfd   :  { %356 = vmatmul.mubr.f32.gmra.mxu1 %v173_v37 }
  0xfe   :  { %360 = vmatprep.mubr.f32.mxu1 %v1964_v19  ;;  %v203_v19 = vpop.f32.mrf.mxu0 }
 0x101   :  { %361 = vmatmul.mubr.f32.gmra.mxu1 %v1635_v24 }
 0x102   :  { %365 = vmatprep.mubr.f32.mxu1 %v1951_v16  ;;  %v1647_v16 = vpop.f32.mrf.mxu0 }
 0x105   :  { %366 = vmatmul.mubr.f32.gmra.mxu1 %v183_v31 }
 0x106   :  { %370 = vmatprep.mubr.f32.mxu1 %v1938_v13  ;;  %v213_v13 = vpop.f32.mrf.mxu0 }
 0x109   :  { %371 = vmatmul.mubr.f32.gmra.mxu1 %v1638_v34 }
 0x10a   :  { %375 = vmatprep.mubr.f32.mxu1 %v1916_v8  ;;  %v424_v8 = vld [vmem:[%s2543_s4 + $0x10] sm:$0xff] }
 0x10d   :  { %376 = vmatmul.mubr.f32.gmra.mxu1 %v193_v25 }
 0x10e   :  { %380 = vmatprep.mubr.f32.mxu1 %v1908_v6  ;;  %v426_v6 = vld [vmem:[%s2543_s4 + $0x20] sm:$0xff] }
 0x111   :  { %381 = vmatmul.mubr.f32.gmra.mxu1 %v1641_v28 }
 0x112   :  { %385 = vmatprep.mubr.f32.mxu1 %v1891_v3  ;;  %v430_v3 = vld [vmem:[%s2543_s4 + $0x40] sm:$0xff] }
 0x113   :  { %477 = vmatpush1.msra.mxu0 %v430_v3 }
 0x115   :  { %386 = vmatmul.mubr.f32.gmra.mxu1 %v203_v19 }
 0x116   :  { %390 = vmatprep.mubr.f32.mxu1 %v1884_v2  ;;  %v429_v2 = vld [vmem:[%s2543_s4 + $0x38] sm:$0xff] }
 0x117   :  { %478 = vmatprep.subr.mxu0 %v429_v2 }
 0x119   :  { %391 = vmatmul.mubr.f32.gmra.mxu1 %v1644_v22 }
 0x11a   :  { %395 = vmatprep.mubr.f32.mxu1 %v1877_v1  ;;  %v428_v1 = vld [vmem:[%s2543_s4 + $0x30] sm:$0xff] }
 0x11b   :  { %479 = vmatpush1.msra.mxu0 %v428_v1 }
 0x11d   :  { %396 = vmatmul.mubr.f32.gmra.mxu1 %v213_v13 }
 0x11e   :  { %400 = vmatprep.mubr.f32.mxu1 %v1872_v0  ;;  %v427_v0 = vld [vmem:[%s2543_s4 + $0x28] sm:$0xff] }
 0x11f   :  { %480 = vmatprep.subr.mxu0 %v427_v0 }
 0x120   :  { %481 = vmatpush1.msra.mxu0 %v426_v6 }
 0x121   :  { %401 = vmatmul.mubr.f32.gmra.mxu1 %v1647_v16 }
 0x122   :  { %1680 = vmatprep.mubr.f32.mxu1 %v1347_v7  ;;  %v425_v7 = vld [vmem:[%s2543_s4 + $0x18] sm:$0xff] }
 0x123   :  { %482 = vmatprep.subr.mxu0 %v425_v7 }
 0x124   :  { %483 = vmatpush1.msra.mxu0 %v424_v8 }
 0x125   :  { %484 = vmatprep.subr.mxu0 %v423_v26 }
 0x126   :  { %485 = vmatpush1.msra.mxu0 %v422_v27 }
 0x1a5   :  { %v1448_v30 = vpop.f32.mrf.mxu1 }
 0x1a7   :  { %v1449_v33 = vpop.f32.mrf.mxu1 }
 0x1a8   :  { %v1450_v35 = vadd.f32 %v1449_v33, %v1448_v30 }
 0x1a9   :  { %v1451_v36 = vpop.f32.mrf.mxu1 }
 0x1aa   :  { %v328_v38 = vadd.f32 %v1450_v35, %v2283_v32 }
 0x1ab   :  { %v1452_v40 = vpop.f32.mrf.mxu1 }
 0x1ac   :  { %v406_v41 = vmax.f32 %v328_v38, 0.0  ;;  %v1453_v43 = vadd.f32 %v1452_v40, %v1451_v36 }
 0x1ad   :  { %v1454_v45 = vpop.f32.mrf.mxu1 }
 0x1ae   :  { %v333_v47 = vadd.f32 %v1453_v43, %v2283_v32  ;;  %519 = vmatmul.mubr.f32.vlgmr.msra.gmra.mxu0 %v406_v41 }
 0x1af   :  { %v1455_v48 = vpop.f32.mrf.mxu1  ;;  %524 = vmatprep.mubr.f32.mxu0 %v1822_v29 }
 0x1b0   :  { %v407_v50 = vmax.f32 %v333_v47, 0.0  ;;  %v1456_v52 = vadd.f32 %v1455_v48, %v1454_v45 }
 0x1b1   :  { %v1457_v14 = vpop.f32.mrf.mxu1 }
 0x1b2   :  { %v338_v15 = vadd.f32 %v1456_v52, %v2283_v32  ;;  %525 = vmatmul.mubr.f32.gmra.mxu0 %v407_v50 }
 0x1b3   :  { %v1458_v17 = vpop.f32.mrf.mxu1  ;;  %530 = vmatprep.mubr.f32.mxu0 %v1822_v29 }
 0x1b4   :  { %v408_v18 = vmax.f32 %v338_v15, 0.0  ;;  %v1459_v20 = vadd.f32 %v1458_v17, %v1457_v14 }
 0x1b5   :  { %v1460_v21 = vpop.f32.mrf.mxu1 }
 0x1b6   :  { %v343_v23 = vadd.f32 %v1459_v20, %v2283_v32  ;;  %531 = vmatmul.mubr.f32.gmra.mxu0 %v408_v18 }
 0x1b7   :  { %v1461_v24 = vpop.f32.mrf.mxu1  ;;  %536 = vmatprep.mubr.f32.mxu0 %v1822_v29 }
 0x1b8   :  { %v409_v37 = vmax.f32 %v343_v23, 0.0  ;;  %v1462_v34 = vadd.f32 %v1461_v24, %v1460_v21 }
 0x1b9   :  { %v1463_v31 = vpop.f32.mrf.mxu1 }
 0x1ba   :  { %v348_v28 = vadd.f32 %v1462_v34, %v2283_v32  ;;  %537 = vmatmul.mubr.f32.gmra.mxu0 %v409_v37 }
 0x1bb   :  { %v1464_v25 = vpop.f32.mrf.mxu1  ;;  %542 = vmatprep.mubr.f32.mxu0 %v1822_v29 }
 0x1bc   :  { %v410_v22 = vmax.f32 %v348_v28, 0.0  ;;  %v1465_v19 = vadd.f32 %v1464_v25, %v1463_v31 }
 0x1bd   :  { %v1466_v16 = vpop.f32.mrf.mxu1 }
 0x1be   :  { %v353_v13 = vadd.f32 %v1465_v19, %v2283_v32  ;;  %543 = vmatmul.mubr.f32.gmra.mxu0 %v410_v22 }
 0x1bf   :  { %v1467_v3 = vpop.f32.mrf.mxu1  ;;  %548 = vmatprep.mubr.f32.mxu0 %v1822_v29 }
 0x1c0   :  { %v411_v2 = vmax.f32 %v353_v13, 0.0  ;;  %v1468_v1 = vadd.f32 %v1467_v3, %v1466_v16 }
 0x1c1   :  { %v1469_v0 = vpop.f32.mrf.mxu1 }
 0x1c2   :  { %v358_v6 = vadd.f32 %v1468_v1, %v2283_v32  ;;  %549 = vmatmul.mubr.f32.gmra.mxu0 %v411_v2 }
 0x1c3   :  { %v1470_v7 = vpop.f32.mrf.mxu1  ;;  %554 = vmatprep.mubr.f32.mxu0 %v1822_v29 }
 0x1c4   :  { %v412_v8 = vmax.f32 %v358_v6, 0.0  ;;  %v1471_v26 = vadd.f32 %v1470_v7, %v1469_v0 }
 0x1c5   :  { %v1472_v27 = vpop.f32.mrf.mxu1 }
 0x1c6   :  { %v363_v30 = vadd.f32 %v1471_v26, %v2283_v32  ;;  %555 = vmatmul.mubr.f32.gmra.mxu0 %v412_v8 }
 0x1c7   :  { %v1473_v33 = vpop.f32.mrf.mxu1  ;;  %560 = vmatprep.mubr.f32.mxu0 %v1822_v29 }
 0x1c8   :  { %v413_v35 = vmax.f32 %v363_v30, 0.0  ;;  %v1474_v36 = vadd.f32 %v1473_v33, %v1472_v27 }
 0x1c9   :  { %v1475_v38 = vpop.f32.mrf.mxu1 }
 0x1ca   :  { %v368_v40 = vadd.f32 %v1474_v36, %v2283_v32  ;;  %561 = vmatmul.mubr.f32.gmra.mxu0 %v413_v35 }
 0x1cb   :  { %v1476_v41 = vpop.f32.mrf.mxu1  ;;  %566 = vmatprep.mubr.f32.mxu0 %v1822_v29 }
 0x1cc   :  { %v414_v43 = vmax.f32 %v368_v40, 0.0  ;;  %v1477_v45 = vadd.f32 %v1476_v41, %v1475_v38 }
 0x1cd   :  { %v1478_v47 = vpop.f32.mrf.mxu1 }
 0x1ce   :  { %v373_v48 = vadd.f32 %v1477_v45, %v2283_v32  ;;  %567 = vmatmul.mubr.f32.gmra.mxu0 %v414_v43 }
 0x1cf   :  { %v1479_v50 = vpop.f32.mrf.mxu1  ;;  %572 = vmatprep.mubr.f32.mxu0 %v1822_v29 }
 0x1d0   :  { %v415_v52 = vmax.f32 %v373_v48, 0.0  ;;  %v1480_v14 = vadd.f32 %v1479_v50, %v1478_v47 }
 0x1d1   :  { %v1481_v15 = vpop.f32.mrf.mxu1 }
 0x1d2   :  { %v378_v17 = vadd.f32 %v1480_v14, %v2283_v32  ;;  %573 = vmatmul.mubr.f32.gmra.mxu0 %v415_v52 }
 0x1d3   :  { %v1482_v18 = vpop.f32.mrf.mxu1  ;;  %578 = vmatprep.mubr.f32.mxu0 %v1822_v29 }
 0x1d4   :  { %v416_v20 = vmax.f32 %v378_v17, 0.0  ;;  %v1483_v21 = vadd.f32 %v1482_v18, %v1481_v15 }
 0x1d5   :  { %v1484_v23 = vpop.f32.mrf.mxu1 }
 0x1d6   :  { %v383_v24 = vadd.f32 %v1483_v21, %v2283_v32  ;;  %579 = vmatmul.mubr.f32.gmra.mxu0 %v416_v20 }
 0x1d7   :  { %v1485_v37 = vpop.f32.mrf.mxu1  ;;  %584 = vmatprep.mubr.f32.mxu0 %v1822_v29 }
 0x1d8   :  { %v417_v34 = vmax.f32 %v383_v24, 0.0  ;;  %v1486_v31 = vadd.f32 %v1485_v37, %v1484_v23 }
 0x1d9   :  { %v1487_v28 = vpop.f32.mrf.mxu1 }
 0x1da   :  { %v388_v25 = vadd.f32 %v1486_v31, %v2283_v32  ;;  %585 = vmatmul.mubr.f32.gmra.mxu0 %v417_v34 }
 0x1db   :  { %v1488_v22 = vpop.f32.mrf.mxu1  ;;  %590 = vmatprep.mubr.f32.mxu0 %v1822_v29 }
 0x1dc   :  { %v418_v19 = vmax.f32 %v388_v25, 0.0  ;;  %v1489_v16 = vadd.f32 %v1488_v22, %v1487_v28 }
 0x1dd   :  { %v1490_v13 = vpop.f32.mrf.mxu1 }
 0x1de   :  { %v393_v3 = vadd.f32 %v1489_v16, %v2283_v32  ;;  %591 = vmatmul.mubr.f32.gmra.mxu0 %v418_v19 }
 0x1df   :  { %v1491_v2 = vpop.f32.mrf.mxu1  ;;  %596 = vmatprep.mubr.f32.mxu0 %v1822_v29 }
 0x1e0   :  { %v419_v1 = vmax.f32 %v393_v3, 0.0  ;;  %v1492_v0 = vadd.f32 %v1491_v2, %v1490_v13 }
 0x1e1   :  { %v1493_v6 = vpop.f32.mrf.mxu1 }
 0x1e2   :  { %v398_v7 = vadd.f32 %v1492_v0, %v2283_v32  ;;  %597 = vmatmul.mubr.f32.gmra.mxu0 %v419_v1  ;;  %v2492_v1 = vld [vmem:[%s2547_s5] ss:$0 sm:$0xff] }
 0x1e3   :  { %v1494_v8 = vpop.f32.mrf.mxu1  ;;  %602 = vmatprep.mubr.f32.mxu0 %v1822_v29 }
 0x1e4   :  { %v420_v26 = vmax.f32 %v398_v7, 0.0  ;;  %v1495_v27 = vadd.f32 %v1494_v8, %v1493_v6 }
 0x1e6   :  { %v403_v30 = vadd.f32 %v1495_v27, %v2283_v32  ;;  %603 = vmatmul.mubr.f32.gmra.mxu0 %v420_v26 }
 0x1e7   :  { %608 = vmatprep.mubr.f32.mxu0 %v1822_v29 }
 0x1e8   :  { %v421_v33 = vmax.f32 %v403_v30, 0.0 }
 0x1ea   :  { %609 = vmatmul.mubr.f32.gmra.mxu0 %v421_v33 }
 0x26e   :  { %v520_v35 = vpop.f32.mrf.mxu0 }
 0x270   :  { %v2316_v36 = vpop.f32.mrf.mxu0 }
 0x272   :  { %v526_v38 = vpop.f32.mrf.mxu0 }
 0x274   :  { %v2318_v40 = vpop.f32.mrf.mxu0 }
 0x276   :  { %v532_v41 = vpop.f32.mrf.mxu0 }
 0x278   :  { %v2320_v43 = vpop.f32.mrf.mxu0 }
 0x27a   :  { %v538_v45 = vpop.f32.mrf.mxu0 }
 0x27c   :  { %v2322_v47 = vpop.f32.mrf.mxu0 }
 0x27e   :  { %v544_v48 = vpop.f32.mrf.mxu0 }
 0x280   :  { %v2324_v50 = vpop.f32.mrf.mxu0 }
 0x282   :  { %v550_v32 = vpop.f32.mrf.mxu0 }
 0x284   :  { %v2326_v52 = vpop.f32.mrf.mxu0 }
 0x286   :  { %v556_v29 = vpop.f32.mrf.mxu0 }
 0x288   :  { %v2328_v14 = vpop.f32.mrf.mxu0 }
 0x28a   :  { %v562_v15 = vpop.f32.mrf.mxu0 }
 0x28c   :  { %v2330_v17 = vpop.f32.mrf.mxu0 }
 0x28e   :  { %v568_v18 = vpop.f32.mrf.mxu0 }
 0x290   :  { %v2332_v20 = vpop.f32.mrf.mxu0 }
 0x292   :  { %v574_v21 = vpop.f32.mrf.mxu0 }
 0x294   :  { %v2334_v23 = vpop.f32.mrf.mxu0 }
 0x296   :  { %v580_v24 = vpop.f32.mrf.mxu0 }
 0x298   :  { %v2336_v37 = vpop.f32.mrf.mxu0 }
 0x29a   :  { %v586_v34 = vpop.f32.mrf.mxu0 }
 0x29c   :  { %v2338_v31 = vpop.f32.mrf.mxu0 }
 0x29e   :  { %v592_v28 = vpop.f32.mrf.mxu0 }
 0x2a0   :  { %v2340_v25 = vpop.f32.mrf.mxu0 }
 0x2a2   :  { %v598_v22 = vpop.f32.mrf.mxu0 }
 0x2a4   :  { %v2342_v19 = vpop.f32.mrf.mxu0 }
 0x2a6   :  { %v604_v16 = vpop.f32.mrf.mxu0 }
 0x2a8   :  { %v2344_v13 = vpop.f32.mrf.mxu0 }
 0x2aa   :  { %v610_v3 = vpop.f32.mrf.mxu0 }
 0x2ab   :  { %1648 = vmatprep.subr.mxu1 %v610_v3 }
 0x2ac   :  { %1649 = vmatpush3.msra.mxu1 %v610_v3 }
 0x2ad   :  { %1650 = vmatprep.subr.mxu1 %v604_v16 }
 0x2ae   :  { %1651 = vmatpush3.msra.mxu1 %v604_v16 }
 0x2af   :  { %1652 = vmatprep.subr.mxu1 %v598_v22 }
 0x2b0   :  { %1653 = vmatpush3.msra.mxu1 %v598_v22 }
 0x2b1   :  { %1654 = vmatprep.subr.mxu1 %v592_v28 }
 0x2b2   :  { %1655 = vmatpush3.msra.mxu1 %v592_v28 }
 0x2b3   :  { %1656 = vmatprep.subr.mxu1 %v586_v34 }
 0x2b4   :  { %1657 = vmatpush3.msra.mxu1 %v586_v34 }
 0x2b5   :  { %1658 = vmatprep.subr.mxu1 %v580_v24 }
 0x2b6   :  { %1659 = vmatpush3.msra.mxu1 %v580_v24 }
 0x2b7   :  { %1660 = vmatprep.subr.mxu1 %v574_v21 }
 0x2b8   :  { %1661 = vmatpush3.msra.mxu1 %v574_v21 }
 0x2b9   :  { %1662 = vmatprep.subr.mxu1 %v568_v18 }
 0x2ba   :  { %1663 = vmatpush3.msra.mxu1 %v568_v18 }
 0x2bb   :  { %1664 = vmatprep.subr.mxu1 %v562_v15 }
 0x2bc   :  { %1665 = vmatpush3.msra.mxu1 %v562_v15 }
 0x2bd   :  { %1666 = vmatprep.subr.mxu1 %v556_v29 }
 0x2be   :  { %1667 = vmatpush3.msra.mxu1 %v556_v29 }
 0x2bf   :  { %1668 = vmatprep.subr.mxu1 %v550_v32 }
 0x2c0   :  { %1669 = vmatpush3.msra.mxu1 %v550_v32 }
 0x2c1   :  { %1670 = vmatprep.subr.mxu1 %v544_v48 }
 0x2c2   :  { %1671 = vmatpush3.msra.mxu1 %v544_v48 }
 0x2c3   :  { %1672 = vmatprep.subr.mxu1 %v538_v45 }
 0x2c4   :  { %1673 = vmatpush3.msra.mxu1 %v538_v45 }
 0x2c5   :  { %1674 = vmatprep.subr.mxu1 %v532_v41 }
 0x2c6   :  { %1675 = vmatpush3.msra.mxu1 %v532_v41 }
 0x2c7   :  { %1676 = vmatprep.subr.mxu1 %v526_v38 }
 0x2c8   :  { %1677 = vmatpush3.msra.mxu1 %v526_v38 }
 0x2c9   :  { %1678 = vmatprep.subr.mxu1 %v520_v35 }
 0x2ca   :  { %1679 = vmatpush3.msra.mxu1 %v520_v35 }
 0x2cb   :  { %1681 = vmatmul.mubr.f32.vlgmr.msra.gmra.mxu1 %v1348_v42  ;;  %v799_v42 = vadd.s32 120, %v2376_v39 }
 0x2cc   :  { %1683 = vmatprep.mubr.f32.mxu1 %v1351_v44  ;;  %v2382_v44 = vld [vmem:[%s2545_s6] ss:$0 sm:$0xff] }
 0x2cd   :  { %vm820_vm0 = vcmp.eq.s32.totalorder %v799_v42, %v2382_v44  ;;  %vm873_vm1 = vcmp.eq.s32.totalorder %v799_v42, %v2387_v46  ;;  %vm818_vm4 = vcmp.eq.s32.totalorder %v797_v53, %v2382_v44  ;;  %vm815_vm10 = vcmp.eq.s32.totalorder %v794_v56, %v2382_v44 }
 0x2cf   :  { %1684 = vmatmul.mubr.f32.gmra.mxu1 %v1352_v49  ;;  %v798_v49 = vadd.s32 112, %v2376_v39 }
 0x2d0   :  { %1686 = vmatprep.mubr.f32.mxu1 %v1355_v51  ;;  %v1823_v51 = vmov 1.0  }
 0x2d1   :  { %1704 = vmatprep.subr.msk.mxu0 %vm820_vm0, %v1823_v51  ;;  %1760 = vmatprep.subr.msk.mxu1 %vm873_vm1, %v1823_v51  ;;  %vm819_vm2 = vcmp.eq.s32.totalorder %v798_v49, %v2382_v44  ;;  %vm872_vm3 = vcmp.eq.s32.totalorder %v798_v49, %v2387_v46  ;;  %v612_v49 = vpop.f32.mrf.mxu0 }
 0x2d2   :  { %1705 = vmatpush3.msk.msra.mxu0 %vm820_vm0, %v1823_v51  ;;  %1761 = vmatpush3.msk.msra.mxu1 %vm873_vm1, %v1823_v51  ;;  %vm812_vm0 = vcmp.eq.s32.totalorder %v791_v59, %v2382_v44  ;;  %vm865_vm1 = vcmp.eq.s32.totalorder %v791_v59, %v2387_v46 }
 0x2d3   :  { %1687 = vmatmul.mubr.f32.gmra.mxu1 %v1356_v54  ;;  %1706 = vmatprep.subr.msk.mxu0 %vm819_vm2, %v1823_v51  ;;  %v796_v54 = vadd.s32 96, %v2376_v39 }
 0x2d4   :  { %1689 = vmatprep.mubr.f32.mxu1 %v1359_v55  ;;  %1762 = vmatprep.subr.msk.mxu1 %vm872_vm3, %v1823_v51  ;;  %v795_v55 = vadd.s32 88, %v2376_v39 }
 0x2d5   :  { %1707 = vmatpush3.msk.msra.mxu0 %vm819_vm2, %v1823_v51  ;;  %1763 = vmatpush3.msk.msra.mxu1 %vm872_vm3, %v1823_v51  ;;  %vm817_vm6 = vcmp.eq.s32.totalorder %v796_v54, %v2382_v44  ;;  %vm870_vm7 = vcmp.eq.s32.totalorder %v796_v54, %v2387_v46 }
 0x2d6   :  { %1708 = vmatprep.subr.msk.mxu0 %vm818_vm4, %v1823_v51  ;;  %1764 = vmatprep.subr.msk.mxu1 %vm871_vm5, %v1823_v51  ;;  %vm816_vm8 = vcmp.eq.s32.totalorder %v795_v55, %v2382_v44  ;;  %vm869_vm9 = vcmp.eq.s32.totalorder %v795_v55, %v2387_v46 }
 0x2d7   :  { %1690 = vmatmul.mubr.f32.gmra.mxu1 %v1360_v57  ;;  %1709 = vmatpush3.msk.msra.mxu0 %vm818_vm4, %v1823_v51  ;;  %v793_v57 = vadd.s32 72, %v2376_v39 }
 0x2d8   :  { %1692 = vmatprep.mubr.f32.mxu1 %v1363_v58  ;;  %1765 = vmatpush3.msk.msra.mxu1 %vm871_vm5, %v1823_v51  ;;  %v792_v58 = vadd.s32 64, %v2376_v39 }
 0x2d9   :  { %1710 = vmatprep.subr.msk.mxu0 %vm817_vm6, %v1823_v51  ;;  %1766 = vmatprep.subr.msk.mxu1 %vm870_vm7, %v1823_v51  ;;  %vm814_vm12 = vcmp.eq.s32.totalorder %v793_v57, %v2382_v44  ;;  %vm867_vm13 = vcmp.eq.s32.totalorder %v793_v57, %v2387_v46 }
 0x2da   :  { %1711 = vmatpush3.msk.msra.mxu0 %vm817_vm6, %v1823_v51  ;;  %1767 = vmatpush3.msk.msra.mxu1 %vm870_vm7, %v1823_v51  ;;  %vm813_vm14 = vcmp.eq.s32.totalorder %v792_v58, %v2382_v44  ;;  %vm866_vm15 = vcmp.eq.s32.totalorder %v792_v58, %v2387_v46  ;;  %vm809_vm6 = vcmp.eq.s32.totalorder %v788_v62, %v2382_v44 }
 0x2db   :  { %1693 = vmatmul.mubr.f32.gmra.mxu1 %v1364_v60  ;;  %1712 = vmatprep.subr.msk.mxu0 %vm816_vm8, %v1823_v51  ;;  %v790_v60 = vadd.s32 48, %v2376_v39  ;;  %vm862_vm7 = vcmp.eq.s32.totalorder %v788_v62, %v2387_v46 }
 0x2dc   :  { %1695 = vmatprep.mubr.f32.mxu1 %v1367_v61  ;;  %1768 = vmatprep.subr.msk.mxu1 %vm869_vm9, %v1823_v51  ;;  %v789_v61 = vadd.s32 40, %v2376_v39 }
 0x2dd   :  { %1713 = vmatpush3.msk.msra.mxu0 %vm816_vm8, %v1823_v51  ;;  %1769 = vmatpush3.msk.msra.mxu1 %vm869_vm9, %v1823_v51  ;;  %vm811_vm2 = vcmp.eq.s32.totalorder %v790_v60, %v2382_v44  ;;  %vm864_vm3 = vcmp.eq.s32.totalorder %v790_v60, %v2387_v46 }
 0x2de   :  { %1714 = vmatprep.subr.msk.mxu0 %vm815_vm10, %v1823_v51  ;;  %1770 = vmatprep.subr.msk.mxu1 %vm868_vm11, %v1823_v51  ;;  %vm810_vm4 = vcmp.eq.s32.totalorder %v789_v61, %v2382_v44  ;;  %vm863_vm5 = vcmp.eq.s32.totalorder %v789_v61, %v2387_v46 }
 0x2df   :  { %1696 = vmatmul.mubr.f32.gmra.mxu1 %v1368_v63  ;;  %1715 = vmatpush3.msk.msra.mxu0 %vm815_vm10, %v1823_v51  ;;  %v787_v63 = vadd.s32 24, %v2376_v39 }
 0x2e0   :  { %1698 = vmatprep.mubr.f32.mxu1 %v1371_v4  ;;  %1771 = vmatpush3.msk.msra.mxu1 %vm868_vm11, %v1823_v51  ;;  %v786_v4 = vadd.s32 16, %v2376_v39 }
 0x2e1   :  { %1716 = vmatprep.subr.msk.mxu0 %vm814_vm12, %v1823_v51  ;;  %1772 = vmatprep.subr.msk.mxu1 %vm867_vm13, %v1823_v51  ;;  %vm808_vm8 = vcmp.eq.s32.totalorder %v787_v63, %v2382_v44  ;;  %vm861_vm9 = vcmp.eq.s32.totalorder %v787_v63, %v2387_v46 }
 0x2e2   :  { %1717 = vmatpush3.msk.msra.mxu0 %vm814_vm12, %v1823_v51  ;;  %1773 = vmatpush3.msk.msra.mxu1 %vm867_vm13, %v1823_v51  ;;  %vm807_vm10 = vcmp.eq.s32.totalorder %v786_v4, %v2382_v44  ;;  %vm860_vm11 = vcmp.eq.s32.totalorder %v786_v4, %v2387_v46 }
 0x2e3   :  { %1699 = vmatmul.mubr.f32.gmra.mxu1 %v1372_v10  ;;  %1718 = vmatprep.subr.msk.mxu0 %vm813_vm14, %v1823_v51  ;;  %v785_v10 = vadd.s32 8, %v2376_v39 }
 0x2e4   :  { %1701 = vmatprep.mubr.f32.mxu1 %v1375_v11  ;;  %1774 = vmatprep.subr.msk.mxu1 %vm866_vm15, %v1823_v51 }
 0x2e5   :  { %1719 = vmatpush3.msk.msra.mxu0 %vm813_vm14, %v1823_v51  ;;  %1775 = vmatpush3.msk.msra.mxu1 %vm866_vm15, %v1823_v51  ;;  %vm806_vm12 = vcmp.eq.s32.totalorder %v785_v10, %v2382_v44  ;;  %vm859_vm13 = vcmp.eq.s32.totalorder %v785_v10, %v2387_v46  ;;  %vm805_vm14 = vcmp.eq.s32.totalorder %v2376_v39, %v2382_v44 }
 0x2e6   :  { %1720 = vmatprep.subr.msk.mxu0 %vm812_vm0, %v1823_v51  ;;  %1776 = vmatprep.subr.msk.mxu1 %vm865_vm1, %v1823_v51  ;;  %vm858_vm15 = vcmp.eq.s32.totalorder %v2376_v39, %v2387_v46 }
 0x2e7   :  { %1702 = vmatmul.mubr.f32.gmra.mxu1 %v1376_v12  ;;  %1721 = vmatpush3.msk.msra.mxu0 %vm812_vm0, %v1823_v51 }
 0x2e8   :  { %1777 = vmatpush3.msk.msra.mxu1 %vm865_vm1, %v1823_v51  ;;  %1722 = vmatprep.subr.msk.mxu0 %vm811_vm2, %v1823_v51 }
 0x2e9   :  { %1778 = vmatprep.subr.msk.mxu1 %vm864_vm3, %v1823_v51  ;;  %1723 = vmatpush3.msk.msra.mxu0 %vm811_vm2, %v1823_v51 }
 0x2ea   :  { %1779 = vmatpush3.msk.msra.mxu1 %vm864_vm3, %v1823_v51  ;;  %1724 = vmatprep.subr.msk.mxu0 %vm810_vm4, %v1823_v51 }
 0x2eb   :  { %1780 = vmatprep.subr.msk.mxu1 %vm863_vm5, %v1823_v51  ;;  %1725 = vmatpush3.msk.msra.mxu0 %vm810_vm4, %v1823_v51 }
 0x2ec   :  { %1781 = vmatpush3.msk.msra.mxu1 %vm863_vm5, %v1823_v51  ;;  %1726 = vmatprep.subr.msk.mxu0 %vm809_vm6, %v1823_v51 }
 0x2ed   :  { %1782 = vmatprep.subr.msk.mxu1 %vm862_vm7, %v1823_v51  ;;  %1727 = vmatpush3.msk.msra.mxu0 %vm809_vm6, %v1823_v51 }
 0x2ee   :  { %1783 = vmatpush3.msk.msra.mxu1 %vm862_vm7, %v1823_v51  ;;  %1728 = vmatprep.subr.msk.mxu0 %vm808_vm8, %v1823_v51 }
 0x2ef   :  { %1784 = vmatprep.subr.msk.mxu1 %vm861_vm9, %v1823_v51  ;;  %1729 = vmatpush3.msk.msra.mxu0 %vm808_vm8, %v1823_v51 }
 0x2f0   :  { %1785 = vmatpush3.msk.msra.mxu1 %vm861_vm9, %v1823_v51  ;;  %1730 = vmatprep.subr.msk.mxu0 %vm807_vm10, %v1823_v51 }
 0x2f1   :  { %1786 = vmatprep.subr.msk.mxu1 %vm860_vm11, %v1823_v51  ;;  %1731 = vmatpush3.msk.msra.mxu0 %vm807_vm10, %v1823_v51 }
 0x2f2   :  { %1787 = vmatpush3.msk.msra.mxu1 %vm860_vm11, %v1823_v51  ;;  %1732 = vmatprep.subr.msk.mxu0 %vm806_vm12, %v1823_v51 }
 0x2f3   :  { %1788 = vmatprep.subr.msk.mxu1 %vm859_vm13, %v1823_v51  ;;  %1733 = vmatpush3.msk.msra.mxu0 %vm806_vm12, %v1823_v51 }
 0x2f4   :  { %1789 = vmatpush3.msk.msra.mxu1 %vm859_vm13, %v1823_v51  ;;  %1734 = vmatprep.subr.msk.mxu0 %vm805_vm14, %v1823_v51 }
 0x2f5   :  { %1790 = vmatprep.subr.msk.mxu1 %vm858_vm15, %v1823_v51  ;;  %1735 = vmatpush3.msk.msra.mxu0 %vm805_vm14, %v1823_v51 }
 0x2f6   :  { %1791 = vmatpush3.msk.msra.mxu1 %vm858_vm15, %v1823_v51 }
 0x38b   :  { %v1682_v9 = vpop.f32.mrf.mxu1 }
 0x38c   :  { %v687_v0 = vadd.f32 %v1682_v9, %v2318_v40 }
 0x38d   :  { %v681_v11 = vpop.f32.mrf.mxu1 }
 0x38e   :  { %v682_v12 = vadd.f32 %v681_v11, %v2316_v36  ;;  %v768_v26 = vadd.f32 %v2492_v1, %v687_v0 }
 0x38f   :  { %v1685_v2 = vpop.f32.mrf.mxu1 }
 0x390   :  { %v767_v6 = vadd.f32 %v2492_v1, %v682_v12  ;;  %v697_v30 = vadd.f32 %v1685_v2, %v2322_v47 }
 0x391   :  { %v691_v7 = vpop.f32.mrf.mxu1 }
 0x392   :  { %906 = vxpose.xlu0.b32.start [1/16] %v767_v6, 128  ;;  %v692_v8 = vadd.f32 %v691_v7, %v2320_v43  ;;  %v770_v38 = vadd.f32 %v2492_v1, %v697_v30 }
 0x393   :  { %v1688_v27 = vpop.f32.mrf.mxu1 }
 0x394   :  { %v769_v33 = vadd.f32 %v2492_v1, %v692_v8  ;;  %v707_v41 = vadd.f32 %v1688_v27, %v2326_v52 }
 0x395   :  { %v701_v35 = vpop.f32.mrf.mxu1 }
 0x396   :  { %907 = vxpose.xlu0.b32.cont [2/16] %v768_v26, 128  ;;  %v702_v36 = vadd.f32 %v701_v35, %v2324_v50  ;;  %v772_v47 = vadd.f32 %v2492_v1, %v707_v41 }
 0x397   :  { %v1691_v40 = vpop.f32.mrf.mxu1 }
 0x398   :  { %v771_v43 = vadd.f32 %v2492_v1, %v702_v36  ;;  %v717_v29 = vadd.f32 %v1691_v40, %v2330_v17 }
 0x399   :  { %v711_v45 = vpop.f32.mrf.mxu1 }
 0x39a   :  { %908 = vxpose.xlu0.b32.cont [3/16] %v769_v33, 128  ;;  %v712_v48 = vadd.f32 %v711_v45, %v2328_v14  ;;  %v774_v52 = vadd.f32 %v2492_v1, %v717_v29 }
 0x39b   :  { %v1694_v32 = vpop.f32.mrf.mxu1 }
 0x39c   :  { %v773_v50 = vadd.f32 %v2492_v1, %v712_v48  ;;  %v727_v24 = vadd.f32 %v1694_v32, %v2334_v23 }
 0x39d   :  { %v721_v15 = vpop.f32.mrf.mxu1 }
 0x39e   :  { %909 = vxpose.xlu0.b32.cont [4/16] %v770_v38, 128  ;;  %v722_v18 = vadd.f32 %v721_v15, %v2332_v20  ;;  %v776_v17 = vadd.f32 %v2492_v1, %v727_v24 }
 0x39f   :  { %v1697_v21 = vpop.f32.mrf.mxu1 }
 0x3a0   :  { %v775_v14 = vadd.f32 %v2492_v1, %v722_v18  ;;  %v737_v16 = vadd.f32 %v1697_v21, %v2338_v31 }
 0x3a1   :  { %v731_v34 = vpop.f32.mrf.mxu1 }
 0x3a2   :  { %910 = vxpose.xlu0.b32.cont [5/16] %v771_v43, 128  ;;  %v732_v28 = vadd.f32 %v731_v34, %v2336_v37  ;;  %v778_v23 = vadd.f32 %v2492_v1, %v737_v16 }
 0x3a3   :  { %v1700_v22 = vpop.f32.mrf.mxu1 }
 0x3a4   :  { %v777_v20 = vadd.f32 %v2492_v1, %v732_v28  ;;  %v747_v42 = vadd.f32 %v1700_v22, %v2342_v19 }
 0x3a5   :  { %v741_v3 = vpop.f32.mrf.mxu1 }
 0x3a6   :  { %911 = vxpose.xlu0.b32.cont [6/16] %v772_v47, 128  ;;  %v742_v5 = vadd.f32 %v741_v3, %v2340_v25  ;;  %v780_v31 = vadd.f32 %v2492_v1, %v747_v42 }
 0x3a7   :  { %v1703_v39 = vpop.f32.mrf.mxu1 }
 0x3a8   :  { %v779_v37 = vadd.f32 %v2492_v1, %v742_v5  ;;  %v757_v51 = vadd.f32 %v1703_v39, %v612_v49 }
 0x3a9   :  { %v751_v44 = vpop.f32.mrf.mxu1 }
 0x3aa   :  { %912 = vxpose.xlu0.b32.cont [7/16] %v773_v50, 128  ;;  %v752_v46 = vadd.f32 %v751_v44, %v2344_v13  ;;  %v782_v25 = vadd.f32 %v2492_v1, %v757_v51 }
 0x3ac   :  { %v781_v53 = vadd.f32 %v2492_v1, %v752_v46 }
 0x3ae   :  { %913 = vxpose.xlu0.b32.cont [8/16] %v774_v52, 128 }
 0x3b2   :  { %914 = vxpose.xlu0.b32.cont [9/16] %v775_v14, 128 }
 0x3b6   :  { %915 = vxpose.xlu0.b32.cont [10/16] %v776_v17, 128 }
 0x3ba   :  { %916 = vxpose.xlu0.b32.cont [11/16] %v777_v20, 128 }
 0x3be   :  { %917 = vxpose.xlu0.b32.cont [12/16] %v778_v23, 128 }
 0x3c2   :  { %918 = vxpose.xlu0.b32.cont [13/16] %v779_v37, 128 }
 0x3c6   :  { %919 = vxpose.xlu0.b32.cont [14/16] %v780_v31, 128 }
 0x3ca   :  { %920 = vxpose.xlu0.b32.cont [15/16] %v781_v53, 128 }
 0x3ce   :  { %921 = vxpose.xlu0.b32.end [16/16] %v782_v25, 128 }
 0x40e   :  { %v922_v54 = vpop.trf.xlu0 }
 0x40f   :  { %1736 = vmatprep.mubr.f32.mxu0 %v922_v54  ;;  %1792 = vmatprep.mubr.f32.mxu1 %v922_v54 }
 0x412   :  { %v923_v19 = vpop.trf.xlu0 }
 0x413   :  { %1737 = vmatmul.mubr.f32.vlgmr.msra.gmra.mxu0 %v923_v19  ;;  %1793 = vmatmul.mubr.f32.vlgmr.msra.gmra.mxu1 %v923_v19 }
 0x416   :  { %v924_v55 = vpop.trf.xlu0 }
 0x417   :  { %1739 = vmatprep.mubr.f32.mxu0 %v924_v55  ;;  %1795 = vmatprep.mubr.f32.mxu1 %v924_v55 }
 0x41a   :  { %v925_v13 = vpop.trf.xlu0 }
 0x41b   :  { %1740 = vmatmul.mubr.f32.gmra.mxu0 %v925_v13  ;;  %1796 = vmatmul.mubr.f32.gmra.mxu1 %v925_v13 }
 0x41e   :  { %v926_v56 = vpop.trf.xlu0 }
 0x41f   :  { %1742 = vmatprep.mubr.f32.mxu0 %v926_v56  ;;  %1798 = vmatprep.mubr.f32.mxu1 %v926_v56 }
 0x422   :  { %v927_v57 = vpop.trf.xlu0 }
 0x423   :  { %1743 = vmatmul.mubr.f32.gmra.mxu0 %v927_v57  ;;  %1799 = vmatmul.mubr.f32.gmra.mxu1 %v927_v57 }
 0x426   :  { %v928_v58 = vpop.trf.xlu0 }
 0x427   :  { %1745 = vmatprep.mubr.f32.mxu0 %v928_v58  ;;  %1801 = vmatprep.mubr.f32.mxu1 %v928_v58 }
 0x42a   :  { %v929_v59 = vpop.trf.xlu0 }
 0x42b   :  { %1746 = vmatmul.mubr.f32.gmra.mxu0 %v929_v59  ;;  %1802 = vmatmul.mubr.f32.gmra.mxu1 %v929_v59 }
 0x42e   :  { %v930_v60 = vpop.trf.xlu0 }
 0x42f   :  { %1748 = vmatprep.mubr.f32.mxu0 %v930_v60  ;;  %1804 = vmatprep.mubr.f32.mxu1 %v930_v60 }
 0x432   :  { %v931_v61 = vpop.trf.xlu0 }
 0x433   :  { %1749 = vmatmul.mubr.f32.gmra.mxu0 %v931_v61  ;;  %1805 = vmatmul.mubr.f32.gmra.mxu1 %v931_v61 }
 0x436   :  { %v932_v62 = vpop.trf.xlu0 }
 0x437   :  { %1751 = vmatprep.mubr.f32.mxu0 %v932_v62  ;;  %1807 = vmatprep.mubr.f32.mxu1 %v932_v62 }
 0x43a   :  { %v933_v63 = vpop.trf.xlu0 }
 0x43b   :  { %1752 = vmatmul.mubr.f32.gmra.mxu0 %v933_v63  ;;  %1808 = vmatmul.mubr.f32.gmra.mxu1 %v933_v63 }
 0x43e   :  { %v934_v4 = vpop.trf.xlu0 }
 0x43f   :  { %1754 = vmatprep.mubr.f32.mxu0 %v934_v4  ;;  %1810 = vmatprep.mubr.f32.mxu1 %v934_v4 }
 0x442   :  { %v935_v9 = vpop.trf.xlu0 }
 0x443   :  { %1755 = vmatmul.mubr.f32.gmra.mxu0 %v935_v9  ;;  %1811 = vmatmul.mubr.f32.gmra.mxu1 %v935_v9 }
 0x446   :  { %v936_v10 = vpop.trf.xlu0 }
 0x447   :  { %1757 = vmatprep.mubr.f32.mxu0 %v936_v10  ;;  %1813 = vmatprep.mubr.f32.mxu1 %v936_v10 }
 0x44a   :  { %v937_v11 = vpop.trf.xlu0 }
 0x44b   :  { %1758 = vmatmul.mubr.f32.gmra.mxu0 %v937_v11  ;;  %1814 = vmatmul.mubr.f32.gmra.mxu1 %v937_v11 }
 0x4d3   :  { %v1738_v12 = vpop.f32.mrf.mxu0  ;;  %v1794_v2 = vpop.f32.mrf.mxu1 }
 0x4d4   :  { %v1229_v35 = vmul.f32 %v1794_v2, %v1738_v12 }
 0x4d5   :  { %v1004_v1 = vpop.f32.mrf.mxu0  ;;  %v1149_v0 = vpop.f32.mrf.mxu1 }
 0x4d6   :  { %v1228_v27 = vmul.f32 %v1149_v0, %v1004_v1 }
 0x4d8   :  { %v1244_v38 = vadd.f32 %v1229_v35, %v1228_v27 }
 0x4db   :  { %v1741_v6 = vpop.f32.mrf.mxu0  ;;  %v1797_v7 = vpop.f32.mrf.mxu1 }
 0x4dc   :  { %v1231_v47 = vmul.f32 %v1797_v7, %v1741_v6 }
 0x4dd   :  { %v1014_v8 = vpop.f32.mrf.mxu0  ;;  %v1159_v26 = vpop.f32.mrf.mxu1 }
 0x4de   :  { %v1230_v36 = vmul.f32 %v1159_v26, %v1014_v8 }
 0x4e0   :  { %v1245_v43 = vadd.f32 %v1244_v38, %v1230_v36 }
 0x4e2   :  { %v1246_v29 = vadd.f32 %v1245_v43, %v1231_v47 }
 0x4e3   :  { %v1744_v30 = vpop.f32.mrf.mxu0  ;;  %v1800_v33 = vpop.f32.mrf.mxu1 }
 0x4e4   :  { %v1233_v24 = vmul.f32 %v1800_v33, %v1744_v30 }
 0x4e5   :  { %v1024_v40 = vpop.f32.mrf.mxu0  ;;  %v1169_v41 = vpop.f32.mrf.mxu1 }
 0x4e6   :  { %v1232_v32 = vmul.f32 %v1169_v41, %v1024_v40 }
 0x4e8   :  { %v1247_v18 = vadd.f32 %v1246_v29, %v1232_v32 }
 0x4ea   :  { %v1248_v34 = vadd.f32 %v1247_v18, %v1233_v24 }
 0x4eb   :  { %v1747_v45 = vpop.f32.mrf.mxu0  ;;  %v1803_v48 = vpop.f32.mrf.mxu1 }
 0x4ec   :  { %v1235_v16 = vmul.f32 %v1803_v48, %v1747_v45 }
 0x4ed   :  { %v1034_v50 = vpop.f32.mrf.mxu0  ;;  %v1179_v15 = vpop.f32.mrf.mxu1 }
 0x4ee   :  { %v1234_v14 = vmul.f32 %v1179_v15, %v1034_v50 }
 0x4f0   :  { %v1249_v22 = vadd.f32 %v1248_v34, %v1234_v14 }
 0x4f2   :  { %v1250_v23 = vadd.f32 %v1249_v22, %v1235_v16 }
 0x4f3   :  { %v1750_v52 = vpop.f32.mrf.mxu0  ;;  %v1806_v21 = vpop.f32.mrf.mxu1 }
 0x4f4   :  { %v1237_v44 = vmul.f32 %v1806_v21, %v1750_v52 }
 0x4f5   :  { %v1044_v28 = vpop.f32.mrf.mxu0  ;;  %v1189_v17 = vpop.f32.mrf.mxu1 }
 0x4f6   :  { %v1236_v20 = vmul.f32 %v1189_v17, %v1044_v28 }
 0x4f8   :  { %v1251_v37 = vadd.f32 %v1250_v23, %v1236_v20 }
 0x4fa   :  { %v1252_v31 = vadd.f32 %v1251_v37, %v1237_v44 }
 0x4fb   :  { %v1753_v3 = vpop.f32.mrf.mxu0  ;;  %v1809_v5 = vpop.f32.mrf.mxu1 }
 0x4fc   :  { %v1239_v19 = vmul.f32 %v1809_v5, %v1753_v3 }
 0x4fd   :  { %v1054_v39 = vpop.f32.mrf.mxu0  ;;  %v1199_v42 = vpop.f32.mrf.mxu1 }
 0x4fe   :  { %v1238_v46 = vmul.f32 %v1199_v42, %v1054_v39 }
 0x500   :  { %v1253_v53 = vadd.f32 %v1252_v31, %v1238_v46 }
 0x502   :  { %v1254_v13 = vadd.f32 %v1253_v53, %v1239_v19 }
 0x503   :  { %v1756_v49 = vpop.f32.mrf.mxu0  ;;  %v1812_v51 = vpop.f32.mrf.mxu1 }
 0x504   :  { %v1241_v59 = vmul.f32 %v1812_v51, %v1756_v49 }
 0x505   :  { %v1064_v25 = vpop.f32.mrf.mxu0  ;;  %v1209_v54 = vpop.f32.mrf.mxu1 }
 0x506   :  { %v1240_v55 = vmul.f32 %v1209_v54, %v1064_v25 }
 0x508   :  { %v1255_v56 = vadd.f32 %v1254_v13, %v1240_v55 }
 0x50a   :  { %v1256_v63 = vadd.f32 %v1255_v56, %v1241_v59 }
 0x50b   :  { %v1759_v57 = vpop.f32.mrf.mxu0  ;;  %v1815_v58 = vpop.f32.mrf.mxu1 }
 0x50c   :  { %v1243_v4 = vmul.f32 %v1815_v58, %v1759_v57 }
 0x50d   :  { %v1074_v60 = vpop.f32.mrf.mxu0  ;;  %v1219_v61 = vpop.f32.mrf.mxu1 }
 0x50e   :  { %v1242_v62 = vmul.f32 %v1219_v61, %v1074_v60 }
 0x510   :  { %v1257_v9 = vadd.f32 %v1256_v63, %v1242_v62 }
 0x512   :  { %v1258_v10 = vadd.f32 %v1257_v9, %v1243_v4 }
 0x514   :  { %v1259_v11 = vrot.slane %v1258_v10, 4 }
 0x516   :  { %v1260_v12 = vadd.f32 %v1259_v11, %v1258_v10 }
 0x518   :  { %v1261_v2 = vrot.slane %v1260_v12, 2 }
 0x51a   :  { %v1262_v1 = vadd.f32 %v1261_v2, %v1260_v12 }
 0x51c   :  { %v1263_v0 = vrot.slane %v1262_v1, 1 }
 0x51e   :  { %v1264_v6 = vadd.f32 %v1263_v0, %v1262_v1 }
 0x520   :  { %v1344_v7 = vmul.f32 -1.442695, %v1264_v6 }
 0x522   :  { %1818 = vpow2.f32 %v1344_v7 }
 0x52f   :  { %v1819_v8 = vpop.eup %1818 }
 0x530   :  { %v1268_v26 = vadd.f32 1.0, %v1819_v8 }
 0x532   :  { %1820 = vrcp.f32 %v1268_v26 }
 0x53f   :  { %v1821_v27 = vpop.eup %1820 }
 0x540   :  { %1271 = vst [vmem:[%s2548_s8] sm:$0x1] %v1821_v27 }

</bundles_post_ra>
